<compile_context>
chip_gen: v6e
topology: v6e:2x2x1
jax: 0.10.0
libtpu: 0.0.40
codegen_flags: <defaults>
</compile_context>

<pallas_src>
import functools

import jax
import jax.numpy as jnp
from jax import lax
from jax.experimental import pallas as pl
from jax.experimental.pallas import tpu as pltpu

IN_FEATURES = 25        # nn.Linear(25, dim)
BN_EPS = 1e-5           # torch BatchNorm1d default eps
_VMEM_LIMIT = 32 * 1024 * 1024


def _round_up(n, m):
    return ((n + m - 1) // m) * m


# ---------------------------------------------------------------------------
# Pass 1: per-column sum / sum^2 of y1 = x @ W1 + b1 over the (real) batch.
# Grid over batch tiles; accumulators live in the resident output blocks.
# ---------------------------------------------------------------------------
def _bn1_stats_kernel(x_ref, w1_ref, b1_ref, sum_ref, sumsq_ref, *, tile_rows, batch):
    j = pl.program_id(0)

    @pl.when(j == 0)
    def _init():
        sum_ref[...] = jnp.zeros_like(sum_ref)
        sumsq_ref[...] = jnp.zeros_like(sumsq_ref)

    x = x_ref[...].astype(jnp.float32)                                   # (TB, 25)
    y1 = jnp.dot(x, w1_ref[...], preferred_element_type=jnp.float32) + b1_ref[...]  # (TB, D)

    # Mask out padded rows (padded x rows are zero, but y1 there would be b1, not 0).
    row = lax.broadcasted_iota(jnp.int32, y1.shape, 0) + j * tile_rows
    y1 = jnp.where(row < batch, y1, 0.0)

    sum_ref[...] += jnp.sum(y1, axis=0, keepdims=True)
    sumsq_ref[...] += jnp.sum(y1 * y1, axis=0, keepdims=True)


# ---------------------------------------------------------------------------
# Pass 2: h = x @ W1_folded + b1_folded ; softsign ; y2 = w2 . h^T  (lane-dense row).
# BN1 is already folded into (W1_folded, b1_folded) by the wrapper.
# ---------------------------------------------------------------------------
def _mlp_apply_kernel(x_ref, w1_ref, b1_ref, w2_ref, out_ref):
    x = x_ref[...].astype(jnp.float32)                                   # (TB, 25)
    h = jnp.dot(x, w1_ref[...], preferred_element_type=jnp.float32) + b1_ref[...]  # (TB, D)

    # Softsign: h / (1 + |h|).  Reciprocal goes to the EUP slot (VPU stays free).
    h = h * pl.reciprocal(1.0 + jnp.abs(h), approx=False)

    # fc2 as a transposed-RHS matmul: (1, D) x (TB, D)^T -> (1, TB).
    # This yields the lane-dense output row directly (no (TB, 1) column store).
    out_ref[...] = lax.dot_general(
        w2_ref[...], h, (((1,), (1,)), ((), ())),
        preferred_element_type=jnp.float32)


# ---------------------------------------------------------------------------
# Pass 3: BatchNorm1d(1) over the (1, B_padded) y2 row (training-mode batch stats).
# Grid-less: all of y2 is only 4 bytes per batch row.
# ---------------------------------------------------------------------------
def _bn2_kernel(y2_ref, sc_ref, out_ref, *, batch):
    y2 = y2_ref[...] + sc_ref[0]                                         # + fc2 bias
    lane = lax.broadcasted_iota(jnp.int32, y2.shape, 1)
    valid = (lane < batch).astype(jnp.float32)
    inv_b = 1.0 / batch

    mu = jnp.sum(y2 * valid, axis=1, keepdims=True) * inv_b              # (1, 1)
    d = (y2 - mu) * valid
    var = jnp.sum(d * d, axis=1, keepdims=True) * inv_b                  # biased, like torch train mode

    scale = sc_ref[1] * lax.rsqrt(var + BN_EPS)                          # gamma2 / sigma
    shift = sc_ref[2] - mu * scale                                       # beta2 - mu * scale
    out_ref[...] = y2 * scale + shift


def simple_mlp_forward(x, w1, b1, bn1_g, bn1_b, w2, b2, bn2_g, bn2_b, *, tile_rows=4096):
    B, F = x.shape
    assert F == IN_FEATURES
    D = w1.shape[0]
    f32 = jnp.float32

    # Tile-row selection: multiple of 8 always; multiple of 128 when multi-tile so the
    # lane-dense output block satisfies the (8, 128) BlockSpec rule.
    TB = _round_up(B, 8)
    if TB > tile_rows:
        TB = _round_up(min(int(tile_rows), TB), 128)
    Bp = _round_up(B, TB)
    T = Bp // TB
    xp = x if Bp == B else jnp.pad(x, ((0, Bp - B), (0, 0)))             # keep original dtype

    # Parameter prep (tiny, O(25*D)): pre-transpose fc1 so the kernel never transposes.
    w1t = jnp.asarray(w1, f32).T.reshape(IN_FEATURES, D)                 # (25, D)
    b1r = jnp.asarray(b1, f32).reshape(1, D)
    g1 = jnp.asarray(bn1_g, f32).reshape(1, D)
    be1 = jnp.asarray(bn1_b, f32).reshape(1, D)
    w2r = jnp.asarray(w2, f32).reshape(1, D)

    x_itemsize = jnp.dtype(x.dtype).itemsize
    param_bytes = (IN_FEATURES * D + 3 * D) * 4

    # ---- Pass 1: BN1 batch statistics --------------------------------------------------
    sums, sumsqs = pl.pallas_call(
        functools.partial(_bn1_stats_kernel, tile_rows=TB, batch=B),
        out_shape=(jax.ShapeDtypeStruct((1, D), f32),
                   jax.ShapeDtypeStruct((1, D), f32)),
        grid=(T,),
        in_specs=[
            pl.BlockSpec((TB, IN_FEATURES), lambda j: (j, 0)),
            pl.BlockSpec((IN_FEATURES, D), lambda j: (0, 0)),
            pl.BlockSpec((1, D), lambda j: (0, 0)),
        ],
        out_specs=(pl.BlockSpec((1, D), lambda j: (0, 0)),
                   pl.BlockSpec((1, D), lambda j: (0, 0))),
        compiler_params=pltpu.CompilerParams(
            dimension_semantics=("arbitrary",),          # accumulators across the batch axis
            vmem_limit_bytes=_VMEM_LIMIT),
        cost_estimate=pl.CostEstimate(
            flops=2 * Bp * IN_FEATURES * D + 4 * Bp * D,
            transcendentals=0,
            bytes_accessed=Bp * IN_FEATURES * x_itemsize + param_bytes + 2 * D * 4),
    )(xp, w1t, b1r)

    # Fold BN1 through fc1 (tiny parameter-scale math): h = x @ W1f + b1f.
    mu1 = sums / B
    var1 = jnp.maximum(sumsqs / B - mu1 * mu1, 0.0)
    a1 = g1 * lax.rsqrt(var1 + BN_EPS)
    w1f = w1t * a1                                                       # (25, D)
    b1f = (b1r - mu1) * a1 + be1                                         # (1, D)

    # ---- Pass 2: folded fc1 + softsign + fc2, lane-dense (1, Bp) output -----------------
    y2_row = pl.pallas_call(
        _mlp_apply_kernel,
        out_shape=jax.ShapeDtypeStruct((1, Bp), f32),
        grid=(T,),
        in_specs=[
            pl.BlockSpec((TB, IN_FEATURES), lambda j: (j, 0)),
            pl.BlockSpec((IN_FEATURES, D), lambda j: (0, 0)),
            pl.BlockSpec((1, D), lambda j: (0, 0)),
            pl.BlockSpec((1, D), lambda j: (0, 0)),
        ],
        out_specs=pl.BlockSpec((1, TB), lambda j: (0, j)),
        compiler_params=pltpu.CompilerParams(
            dimension_semantics=("parallel",),           # independent tiles -> both TCs on v7x
            vmem_limit_bytes=_VMEM_LIMIT),
        cost_estimate=pl.CostEstimate(
            flops=2 * Bp * IN_FEATURES * D + 6 * Bp * D,
            transcendentals=Bp * D,
            bytes_accessed=Bp * IN_FEATURES * x_itemsize + Bp * 4 + param_bytes),
    )(xp, w1f, b1f, w2r)

    # ---- Pass 3: BatchNorm1d(1) epilogue over the y2 row --------------------------------
    sc = jnp.stack([jnp.asarray(b2, f32).reshape(()),
                    jnp.asarray(bn2_g, f32).reshape(()),
                    jnp.asarray(bn2_b, f32).reshape(())])                # (3,) -> SMEM
    out_row = pl.pallas_call(
        functools.partial(_bn2_kernel, batch=B),
        out_shape=jax.ShapeDtypeStruct((1, Bp), f32),
        in_specs=[pl.BlockSpec(memory_space=pltpu.MemorySpace.VMEM),
                  pl.BlockSpec(memory_space=pltpu.MemorySpace.SMEM)],
        out_specs=pl.BlockSpec(memory_space=pltpu.MemorySpace.VMEM),
        compiler_params=pltpu.CompilerParams(vmem_limit_bytes=_VMEM_LIMIT),
    )(y2_row, sc)

    return out_row[0, :B].reshape(B, 1)


def simple_mlp_reference(x, w1, b1, bn1_g, bn1_b, w2, b2, bn2_g, bn2_b):
    # Plain-JAX reference mirroring the PyTorch forward (train-mode BatchNorm).
    x = x.astype(jnp.float32)
    y1 = x @ w1.T + b1
    mu1 = jnp.mean(y1, axis=0, keepdims=True)
    var1 = jnp.mean((y1 - mu1) ** 2, axis=0, keepdims=True)
    h = (y1 - mu1) / jnp.sqrt(var1 + BN_EPS) * bn1_g + bn1_b
    h = h / (1.0 + jnp.abs(h))                                           # Softsign
    y2 = h @ w2.reshape(-1, 1) + b2
    mu2 = jnp.mean(y2, axis=0, keepdims=True)
    var2 = jnp.mean((y2 - mu2) ** 2, axis=0, keepdims=True)
    return (y2 - mu2) / jnp.sqrt(var2 + BN_EPS) * bn2_g + bn2_b


if __name__ == "__main__":
    D = 32
    key = jax.random.PRNGKey(0)
    kx, kx2, k1, k2, k3, k4, k5 = jax.random.split(key, 7)

    # Parameters (shapes from the module's __init__), deterministic.
    w1 = jax.random.normal(k1, (D, IN_FEATURES), dtype=jnp.float32) * 0.1   # Linear(25, dim)
    b1 = jax.random.normal(k3, (D,), dtype=jnp.float32) * 0.01
    bn1_g = 1.0 + jax.random.normal(k4, (D,), dtype=jnp.float32) * 0.1      # BatchNorm1d(dim)
    bn1_b = jax.random.normal(k5, (D,), dtype=jnp.float32) * 0.05
    w2 = jax.random.normal(k2, (1, D), dtype=jnp.float32) * 0.1             # Linear(dim, 1)
    b2 = jnp.float32(0.05)
    bn2_g = jnp.float32(1.0)                                                # BatchNorm1d(1)
    bn2_b = jnp.float32(0.0)
    params = (w1, b1, bn1_g, bn1_b, w2, b2, bn2_g, bn2_b)

    # Small shape (B=2): single-tile path.
    x = jax.random.normal(kx, (2, IN_FEATURES), dtype=jnp.float32)
    out = jax.block_until_ready(simple_mlp_forward(x, *params))
    ref = simple_mlp_reference(x, *params)
    assert out.shape == (2, 1)
    assert jnp.allclose(out, ref, atol=1e-4, rtol=1e-4), (out, ref)

    # Multi-tile path (grid over batch, padding + masking, lane-dense 128-wide out blocks).
    x2 = jax.random.normal(kx2, (300, IN_FEATURES), dtype=jnp.float32)
    out2 = jax.block_until_ready(simple_mlp_forward(x2, *params, tile_rows=128))
    ref2 = simple_mlp_reference(x2, *params)
    assert out2.shape == (300, 1)
    assert jnp.allclose(out2, ref2, atol=1e-4, rtol=1e-4), float(jnp.max(jnp.abs(out2 - ref2)))

    print("KERNEL_OK")
</pallas_src>

<mosaic_0001>
module attributes {stable_mosaic.version = 11 : i64} {
  func.func @_bn1_stats_kernel(%arg0: i32, %arg1: memref<8x25xf32, #tpu.memory_space<vmem>>, %arg2: memref<25x32xf32, #tpu.memory_space<vmem>>, %arg3: memref<1x32xf32, #tpu.memory_space<vmem>>, %arg4: memref<1x32xf32, #tpu.memory_space<vmem>>, %arg5: memref<1x32xf32, #tpu.memory_space<vmem>>) attributes {dimension_semantics = [#tpu.dimension_semantics<arbitrary>], iteration_bounds = array<i64: 1>, scalar_prefetch = 0 : i64, scratch_operands = 0 : i64, tpu.core_type = #tpu.core_type<tc>, window_params = [{transform_indices = @transform_0, window_bounds = array<i64: 8, 25>}, {pipeline_mode = #tpu.pipeline_mode<synchronous>, transform_indices = @transform_1, window_bounds = array<i64: 25, 32>}, {pipeline_mode = #tpu.pipeline_mode<synchronous>, transform_indices = @transform_2, window_bounds = array<i64: 1, 32>}, {pipeline_mode = #tpu.pipeline_mode<synchronous>, transform_indices = @transform_3, window_bounds = array<i64: 1, 32>}, {pipeline_mode = #tpu.pipeline_mode<synchronous>, transform_indices = @transform_4, window_bounds = array<i64: 1, 32>}]} {
    %c0_i32 = arith.constant 0 : i32
    %0 = arith.cmpi eq, %arg0, %c0_i32 : i32
    %1 = arith.extui %0 : i1 to i32
    %c0_i32_0 = arith.constant 0 : i32
    %2 = arith.cmpi ne, %1, %c0_i32_0 : i32
    scf.if %2 {
      %cst_17 = arith.constant 0.000000e+00 : f32
      %28 = vector.broadcast %cst_17 : f32 to vector<1x32xf32>
      %c0_18 = arith.constant 0 : index
      %c0_19 = arith.constant 0 : index
      %29 = vector.load %arg4[%c0_18, %c0_19] : memref<1x32xf32, #tpu.memory_space<vmem>>, vector<1x32xf32>
      tpu.vector_store %arg4[%c0_18, %c0_19], %28 {strides = array<i32>} : memref<1x32xf32, #tpu.memory_space<vmem>>, vector<1x32xf32>,
      %cst_20 = arith.constant 0.000000e+00 : f32
      %30 = vector.broadcast %cst_20 : f32 to vector<1x32xf32>
      %c0_21 = arith.constant 0 : index
      %c0_22 = arith.constant 0 : index
      %31 = vector.load %arg5[%c0_21, %c0_22] : memref<1x32xf32, #tpu.memory_space<vmem>>, vector<1x32xf32>
      tpu.vector_store %arg5[%c0_21, %c0_22], %30 {strides = array<i32>} : memref<1x32xf32, #tpu.memory_space<vmem>>, vector<1x32xf32>,
    } else {
    }
    %c0 = arith.constant 0 : index
    %c0_1 = arith.constant 0 : index
    %3 = vector.load %arg1[%c0, %c0_1] : memref<8x25xf32, #tpu.memory_space<vmem>>, vector<8x25xf32>
    %c0_2 = arith.constant 0 : index
    %c0_3 = arith.constant 0 : index
    %4 = vector.load %arg2[%c0_2, %c0_3] : memref<25x32xf32, #tpu.memory_space<vmem>>, vector<25x32xf32>
    %cst = arith.constant dense<0.000000e+00> : vector<8x32xf32>
    %5 = tpu.matmul %3, %4, %cst {dimension_numbers = #tpu.dot_dimension_numbers<[1], [0], [0], [1], [0, 0, 1, 1], [], []>} : vector<8x25xf32>, vector<25x32xf32>, vector<8x32xf32> -> vector<8x32xf32>
    %c0_4 = arith.constant 0 : index
    %c0_5 = arith.constant 0 : index
    %6 = vector.load %arg3[%c0_4, %c0_5] : memref<1x32xf32, #tpu.memory_space<vmem>>, vector<1x32xf32>
    %7 = vector.broadcast %6 : vector<1x32xf32> to vector<8x32xf32>
    %8 = arith.addf %5, %7 : vector<8x32xf32>
    %9 = tpu.iota {dimensions = array<i32: 0>} : vector<8x32xi32>
    %c8_i32 = arith.constant 8 : i32
    %10 = arith.muli %arg0, %c8_i32 : i32
    %11 = vector.broadcast %10 : i32 to vector<8x32xi32>
    %12 = arith.addi %9, %11 : vector<8x32xi32>
    %c2_i32 = arith.constant 2 : i32
    %13 = vector.broadcast %c2_i32 : i32 to vector<8x32xi32>
    %14 = arith.cmpi slt, %12, %13 : vector<8x32xi32>
    %cst_6 = arith.constant 0.000000e+00 : f32
    %15 = vector.broadcast %cst_6 : f32 to vector<8x32xf32>
    %16 = arith.select %14, %8, %15 : vector<8x32xi1>, vector<8x32xf32>
    %c0_7 = arith.constant 0 : index
    %c0_8 = arith.constant 0 : index
    %17 = vector.load %arg4[%c0_7, %c0_8] : memref<1x32xf32, #tpu.memory_space<vmem>>, vector<1x32xf32>
    %cst_9 = arith.constant dense<0.000000e+00> : vector<32xf32>
    %18 = vector.multi_reduction <add>, %16, %cst_9 [0] : vector<8x32xf32> to vector<32xf32>
    %19 = vector.shape_cast %18 : vector<32xf32> to vector<1x32xf32>
    %20 = arith.addf %17, %19 : vector<1x32xf32>
    %c0_10 = arith.constant 0 : index
    %c0_11 = arith.constant 0 : index
    %21 = vector.load %arg4[%c0_10, %c0_11] : memref<1x32xf32, #tpu.memory_space<vmem>>, vector<1x32xf32>
    tpu.vector_store %arg4[%c0_10, %c0_11], %20 {strides = array<i32>} : memref<1x32xf32, #tpu.memory_space<vmem>>, vector<1x32xf32>,
    %c0_12 = arith.constant 0 : index
    %c0_13 = arith.constant 0 : index
    %22 = vector.load %arg5[%c0_12, %c0_13] : memref<1x32xf32, #tpu.memory_space<vmem>>, vector<1x32xf32>
    %23 = arith.mulf %16, %16 : vector<8x32xf32>
    %cst_14 = arith.constant dense<0.000000e+00> : vector<32xf32>
    %24 = vector.multi_reduction <add>, %23, %cst_14 [0] : vector<8x32xf32> to vector<32xf32>
    %25 = vector.shape_cast %24 : vector<32xf32> to vector<1x32xf32>
    %26 = arith.addf %22, %25 : vector<1x32xf32>
    %c0_15 = arith.constant 0 : index
    %c0_16 = arith.constant 0 : index
    %27 = vector.load %arg5[%c0_15, %c0_16] : memref<1x32xf32, #tpu.memory_space<vmem>>, vector<1x32xf32>
    tpu.vector_store %arg5[%c0_15, %c0_16], %26 {strides = array<i32>} : memref<1x32xf32, #tpu.memory_space<vmem>>, vector<1x32xf32>,
    return
  }
  func.func @transform_0(%arg0: i32) -> (i32, i32) {
    %c0_i32 = arith.constant 0 : i32
    %c0_i32_0 = arith.constant 0 : i32
    return %arg0, %c0_i32 : i32, i32
  }
  func.func @transform_1(%arg0: i32) -> (i32, i32) {
    %c0_i32 = arith.constant 0 : i32
    %c0_i32_0 = arith.constant 0 : i32
    %c0_i32_1 = arith.constant 0 : i32
    return %c0_i32, %c0_i32_0 : i32, i32
  }
  func.func @transform_2(%arg0: i32) -> (i32, i32) {
    %c0_i32 = arith.constant 0 : i32
    %c0_i32_0 = arith.constant 0 : i32
    %c0_i32_1 = arith.constant 0 : i32
    return %c0_i32, %c0_i32_0 : i32, i32
  }
  func.func @transform_3(%arg0: i32) -> (i32, i32) {
    %c0_i32 = arith.constant 0 : i32
    %c0_i32_0 = arith.constant 0 : i32
    %c0_i32_1 = arith.constant 0 : i32
    return %c0_i32, %c0_i32_0 : i32, i32
  }
  func.func @transform_4(%arg0: i32) -> (i32, i32) {
    %c0_i32 = arith.constant 0 : i32
    %c0_i32_0 = arith.constant 0 : i32
    %c0_i32_1 = arith.constant 0 : i32
    return %c0_i32, %c0_i32_0 : i32, i32
  }
}

</mosaic_0001>

<bundles_post_ra>
// kernel: tpu_custom_call.1
= control target key start
LH: loop header
LB: loop body
LE: loop exit
PB: predicated region body
PF: predicated region fallthrough
CT: control target
= control target key end

     0   :  { %10 = vsyncpa [#allocation3], 0  ;;  %s368_s0 = inlined_call_operand.hbm [shape: f32[8,25], index: 0, kind: input, shape index: {}]   ;;  %s369_s1 = inlined_call_operand.hbm [shape: f32[25,32], index: 1, kind: input, shape index: {}]   ;;  %s370_s2 = inlined_call_operand.vmem [shape: f32[1,32], index: 2, kind: input, shape index: {}]   ;;  %s371_s3 = inlined_call_operand.hbm [shape: f32[1,32], index: 3, kind: output, shape index: {0}]   ;;  %s372_s4 = inlined_call_operand.hbm [shape: f32[1,32], index: 4, kind: output, shape index: {1}]  }
   0x1   :  { %11 = vsyncpa [#allocation6], 0 }
   0x2   :  { %12 = vsyncpa [#allocation4], 0 }
   0x3   :  { %13 = vsyncpa [#allocation9], 0  ;;  %s316_s15 = smov [#allocation2]   ;;  %s317_s17 = smov [#allocation5]  }
   0x4   :  { %s20_s16 = sshll.u32 %s316_s15, 4  ;;  %s29_s18 = sshll.u32 %s317_s17, 4  ;;  %s21_s16 = int_to_ptr.vmem [resolvable:$true] %s20_s16  ;;  %s30_s18 = int_to_ptr.vmem [resolvable:$true] %s29_s18 }
   0x5   :  { %s236_s19 = scalar_lea.vmem %s21_s16, 128  ;;  %p241_p1 = scmp.lt.s32.totalorder %s21_s16, %s21_s16 }
   0x6   :  { %p237_p0 = scmp.ne.s32.totalorder %s21_s16, %s236_s19  ;;  %p242_p2 = scmp.lt.s32.totalorder %s236_s19, %s236_s19 }
   0x8   :  { %p243_p3 = por %p242_p2, %p241_p1 }
   0xa   :  { %p244_p4 = pnand %p243_p3, %p237_p0 }
   0xc   :  { %247 = shalt.err (!%p244_p4)
}
   0xd   :  { %23 = dma.hbm_to_vmem [thread:$0]  %s368_s0, 128, %s21_s16, [#allocation3]  }
   0xe   :  { %s256_s22 = scalar_lea.vmem %s30_s18, 512  ;;  %p261_p6 = scmp.lt.s32.totalorder %s30_s18, %s30_s18 }
   0xf   :  { %p257_p5 = scmp.ne.s32.totalorder %s30_s18, %s256_s22  ;;  %p262_p7 = scmp.lt.s32.totalorder %s256_s22, %s256_s22 }
  0x11   :  { %p263_p8 = por %p262_p7, %p261_p6 }
  0x13   :  { %p264_p9 = pnand %p263_p8, %p257_p5 }
  0x15   :  { %267 = shalt.err (!%p264_p9)
}
  0x16   :  { %s318_s23 = smov 128   ;;  %s319_s24 = smov 8  }
  0x17   :  { %35 = dma.hbm_to_vmem [thread:$0]  %s369_s1, 512, %s30_s18, [#allocation6], %s318_s23, %s318_s23, %s319_s24  }
  0x18   :  { %308 = dma.done.wait [#allocation3], 128  }
  0x19   :  { %309 = vsyncadd [#allocation3], 4294967168 }
  0x1a   :  { %310 = dma.done.wait [#allocation6], 512  }
  0x1b   :  { %311 = vsyncadd [#allocation6], 4294966784  ;;  %v320_v0 = vmov 0.0   ;;  %vm321_vm0 = vmmov 0   ;;  %vm67_vm1 = vcmask 1040384   ;;  %v54_v2 = vld [vmem:[#allocation5 + $0x10] sm:$0xff]  ;;  %v141_v6 = vlaneseq }
  0x1c   :  { %209 = vmatprep.subr.mxu0 %v320_v0  ;;  %217 = vmatprep.mubr.msk.f32.mxu0 %vm321_vm0, %v320_v0  ;;  %v55_v1 = vld [vmem:[#allocation5 + $0x18] sm:$0x1]  ;;  %v53_v3 = vld [vmem:[#allocation5 + $0x8] sm:$0xff]  ;;  %v52_v4 = vld [vmem:[#allocation5] sm:$0xff]  ;;  %vm63_vm2 = vcmask 203776   ;;  %vm48_vm3 = vcmask 253952  }
  0x1d   :  { %210 = vmatpush3.msk.msra.mxu0 %vm67_vm1, %v55_v1  ;;  %v51_v5 = vld [vmem:[#allocation2] sm:$0xff]  ;;  %49 = vst.msk [vmem:[#allocation7] sm:$0x1] %vm48_vm3, %v320_v0  ;;  %50 = vst.msk [vmem:[#allocation8] sm:$0x1] %vm48_vm3, %v320_v0  ;;  %v142_v7 = vshrl.u32 %v141_v6, 7 }
  0x1e   :  { %211 = vmatprep.subr.mxu0 %v320_v0  ;;  %v201_v8 = vld [vmem:[%s370_s2] ss:$0 sm:$0xff]  ;;  %vm149_vm5 = vcmask 261120   ;;  %s322_s2 = smov [#allocation7]   ;;  %s323_s28 = smov [#allocation8]  }
  0x1f   :  { %212 = vmatpush3.msra.mxu0 %v54_v2  ;;  %vm146_vm4 = vcmp.lt.s32.totalorder %v142_v7, 2  ;;  %s177_s27 = sshll.u32 %s322_s2, 4  ;;  %s187_s29 = sshll.u32 %s323_s28, 4  ;;  %s178_s27 = int_to_ptr.vmem [resolvable:$true] %s177_s27  ;;  %s188_s29 = int_to_ptr.vmem [resolvable:$true] %s187_s29 }
  0x20   :  { %213 = vmatprep.subr.mxu0 %v320_v0  ;;  %s268_s30 = scalar_lea.vmem %s178_s27, 16  ;;  %s272_s5 = scalar_lea.vmem %s178_s27, 32 }
  0x21   :  { %214 = vmatpush3.msra.mxu0 %v53_v3  ;;  %p269_p10 = scmp.ne.s32.totalorder %s178_s27, %s268_s30  ;;  %p273_p11 = scmp.lt.s32.totalorder %s178_s27, %s178_s27 }
  0x22   :  { %215 = vmatprep.subr.mxu0 %v320_v0  ;;  %p274_p12 = scmp.lt.s32.totalorder %s272_s5, %s268_s30 }
  0x23   :  { %216 = vmatpush3.msra.mxu0 %v52_v4 }
  0x24   :  { %218 = vmatmul.mubr.msk.f32.vlgmr.msra.gmra.mxu0 %vm63_vm2, %v51_v5  ;;  %v148_v25 = vld [vmem:[#allocation7] sm:$0x1]  ;;  %v160_v28 = vld [vmem:[#allocation8] sm:$0x1]  ;;  %p275_p13 = por %p274_p12, %p273_p11 }
  0x26   :  { %p276_p0 = pnand %p275_p13, %p269_p10 }
  0xe4   :  { %v137_v9 = vpop.f32.mrf.mxu0 }
  0xe5   :  { %v138_v10 = vadd.f32 %v201_v8, %v137_v9 }
  0xe6   :  { %v219_v11 = vpop.f32.mrf.mxu0 }
  0xe7   :  { %v147_v12 = vsel %vm146_vm4, %v138_v10, 0.0 }
  0xe8   :  { %v150_v13 = vsel %vm149_vm5, %v147_v12, 0.0  ;;  %v161_v14 = vmul.f32 %v147_v12, %v147_v12 }
  0xe9   :  { %v151_v15 = vrot.slane %v150_v13, 4 }
  0xea   :  { %v162_v16 = vsel %vm149_vm5, %v161_v14, 0.0 }
  0xeb   :  { %v152_v17 = vadd.f32 %v151_v15, %v150_v13  ;;  %v163_v18 = vrot.slane %v162_v16, 4 }
  0xed   :  { %v153_v19 = vrot.slane %v152_v17, 2  ;;  %v164_v20 = vadd.f32 %v163_v18, %v162_v16 }
  0xef   :  { %v154_v21 = vadd.f32 %v153_v19, %v152_v17  ;;  %v165_v22 = vrot.slane %v164_v20, 2 }
  0xf1   :  { %v155_v23 = vrot.slane %v154_v21, 1  ;;  %v166_v24 = vadd.f32 %v165_v22, %v164_v20 }
  0xf3   :  { %v156_v26 = vadd.f32 %v155_v23, %v154_v21  ;;  %v167_v27 = vrot.slane %v166_v24, 1 }
  0xf5   :  { %v168_v29 = vadd.f32 %v167_v27, %v166_v24  ;;  %v157_v30 = vadd.f32 %v156_v26, %v148_v25 }
  0xf7   :  { %159 = vst.msk [vmem:[#allocation7] sm:$0x1] %vm48_vm3, %v157_v30  ;;  %v169_v31 = vadd.f32 %v168_v29, %v160_v28 }
  0xf8   :  { %279 = shalt.err (!%p276_p0)
}
  0xf9   :  { %180 = dma.vmem_to_hbm [thread:$0]  %s178_s27, 16, %s371_s3, [#allocation4]   ;;  %170 = vst.msk [vmem:[#allocation8] sm:$0x1] %vm48_vm3, %v169_v31 }
  0xfa   :  { %s288_s8 = scalar_lea.vmem %s188_s29, 16  ;;  %s292_s9 = scalar_lea.vmem %s188_s29, 32 }
  0xfb   :  { %p289_p1 = scmp.ne.s32.totalorder %s188_s29, %s288_s8  ;;  %p293_p2 = scmp.lt.s32.totalorder %s188_s29, %s188_s29 }
  0xfc   :  { %p294_p3 = scmp.lt.s32.totalorder %s292_s9, %s288_s8 }
  0xfe   :  { %p295_p4 = por %p294_p3, %p293_p2 }
 0x100   :  { %p296_p5 = pnand %p295_p4, %p289_p1 }
 0x102   :  { %299 = shalt.err (!%p296_p5)
}
 0x103   :  { %190 = dma.vmem_to_hbm [thread:$0]  %s188_s29, 16, %s372_s4, [#allocation9]  }
 0x104   :  { %312 = dma.done.wait [#allocation4], 16  }
 0x105   :  { %313 = vsyncadd [#allocation4], 4294967280 }
 0x106   :  { %314 = dma.done.wait [#allocation9], 16  }
 0x107   :  { %315 = vsyncadd [#allocation9], 4294967280 }
 0x108   :  { %197 = vsyncpa [#allocation3], 1 }
 0x109   :  { %198 = vsyncpa [#allocation6], 1 }
 0x10a   :  { %199 = vsyncpa [#allocation4], 1 }
 0x10b   :  { %200 = vsyncpa [#allocation9], 1 }

</bundles_post_ra>
